<compile_context>
chip_gen: v7x
topology: tpu7x:2x2x1
jax: 0.10.0
libtpu: 0.0.40
codegen_flags: <defaults>
</compile_context>

<pallas_src>
import jax
import jax.numpy as jnp
from jax import lax
from jax.experimental import pallas as pl
from jax.experimental.pallas import tpu as pltpu


def _bi_linear_bmm_kernel(p_ref, d_ref, o_ref):
    # p_ref: (B, 1, H)   projected query row per batch (constant block across the grid)
    # d_ref: (B, tT, H)  streamed D_prime2 tile for this grid step
    # o_ref: (B, 1, tT)  lane-dense output tile (tT multiple of 128)
    #
    # Batched MXU contraction over H: out[b, 0, t] = sum_h p[b, 0, h] * d[b, t, h]
    o_ref[...] = jnp.einsum(
        "bqh,bth->bqt",
        p_ref[...],
        d_ref[...],
        preferred_element_type=jnp.float32,
    ).astype(o_ref.dtype)


def bi_linear(q, w, d_prime2, *, t_tile=None, interpret=False):
    """Forward pass of Bi_Linear: (proj(q) [B,H]) bmm D_prime2^T -> (B, T)."""
    B, I = q.shape
    H, I2 = w.shape
    assert I == I2, (q.shape, w.shape)
    B2, T, H2 = d_prime2.shape
    assert B == B2 and H == H2, (q.shape, w.shape, d_prime2.shape)
    out_dtype = q.dtype

    # --- Projection, hoisted out of the per-tile body (tiny (B,I)@(I,H) matmul).
    # Contract q dim 1 with W dim 1: the weight transpose is folded into the MXU
    # operand load, never materialized.
    p = lax.dot_general(
        q, w,
        dimension_numbers=(((1,), (1,)), ((), ())),
        preferred_element_type=jnp.float32,
    )  # (B, H), f32 accumulation
    # Feed the second contraction in the streaming dtype (bf16 stays bf16 -> native
    # MXU fast path); accumulation in the kernel is f32 via preferred_element_type.
    p = p.astype(d_prime2.dtype)[:, None, :]  # (B, 1, H)

    # --- Lane-dense T tiling: multiple of 128, ~1 MiB of D per buffer so the
    # double-buffered pipeline fits comfortably in v7x's 32 MiB scoped VMEM.
    itemsize = jnp.dtype(d_prime2.dtype).itemsize
    if t_tile is None:
        target_bytes = 1 << 20
        t_tile = max(128, (target_bytes // max(1, B * H * itemsize)) // 128 * 128)
        t_tile = min(t_tile, max(128, pl.cdiv(T, 128) * 128))
    t_tile = int(t_tile)
    num_tiles = int(pl.cdiv(T, t_tile))
    T_pad = num_tiles * t_tile

    d = d_prime2
    if T_pad != T:
        d = jnp.pad(d_prime2, ((0, 0), (0, T_pad - T), (0, 0)))

    # TODO(synk): for very large B or H, add B / H-reduction grid axes (accumulator
    # pattern) instead of keeping them as full block dims.
    out_padded = pl.pallas_call(
        _bi_linear_bmm_kernel,
        out_shape=jax.ShapeDtypeStruct((B, 1, T_pad), out_dtype),
        grid_spec=pltpu.PrefetchScalarGridSpec(
            num_scalar_prefetch=0,
            grid=(num_tiles,),
            in_specs=[
                # Projected query: constant block -> DMA'd once, resident across tiles.
                pl.BlockSpec((B, 1, H), lambda t: (0, 0, 0)),
                # Streamed D tile: full H in the lane dim, tT rows per step.
                pl.BlockSpec((B, t_tile, H), lambda t: (0, t, 0)),
            ],
            out_specs=pl.BlockSpec((B, 1, t_tile), lambda t: (0, 0, t)),
        ),
        compiler_params=pltpu.CompilerParams(
            # Mem-bound streaming kernel: shard T tiles across v7x's 2 TensorCores.
            dimension_semantics=("parallel",),
        ),
        interpret=interpret,
    )(p, d)

    return out_padded[:, 0, :T]


if __name__ == "__main__":
    B = 2
    INPUT_SIZE = 32
    HIDDEN_SIZE = 32
    T = 8

    key = jax.random.PRNGKey(0)
    kq, kd, kw = jax.random.split(key, 3)

    q = jax.random.normal(kq, (B, INPUT_SIZE), dtype=jnp.float32)
    d_prime2 = jax.random.normal(kd, (B, T, HIDDEN_SIZE), dtype=jnp.float32)
    # Deterministic stand-in for nn.Linear(input_size, hidden_size, bias=False).weight
    w = jax.random.normal(kw, (HIDDEN_SIZE, INPUT_SIZE), dtype=jnp.float32) * 0.1

    out = jax.block_until_ready(bi_linear(q, w, d_prime2))

    # Pure-JAX reference of the PyTorch forward.
    proj = q @ w.T                                   # (B, H)
    ref = jnp.einsum("bh,bth->bt", proj, d_prime2)   # (B, T)

    assert out.shape == (B, T)
    assert jnp.allclose(out, ref, atol=1e-4, rtol=1e-4)
    print("KERNEL_OK")
</pallas_src>

<mosaic_0001>
module attributes {stable_mosaic.version = 11 : i64} {
  func.func @_bi_linear_bmm_kernel(%arg0: i32, %arg1: memref<2x1x32xf32, #tpu.memory_space<vmem>>, %arg2: memref<2x128x32xf32, #tpu.memory_space<vmem>>, %arg3: memref<2x1x128xf32, #tpu.memory_space<vmem>>) attributes {dimension_semantics = [#tpu.dimension_semantics<parallel>], iteration_bounds = array<i64: 1>, scalar_prefetch = 0 : i64, scratch_operands = 0 : i64, tpu.core_type = #tpu.core_type<tc>, window_params = [{pipeline_mode = #tpu.pipeline_mode<synchronous>, transform_indices = @transform_0, window_bounds = array<i64: 2, 1, 32>}, {transform_indices = @transform_1, window_bounds = array<i64: 2, 128, 32>}, {transform_indices = @transform_2, window_bounds = array<i64: 2, 1, 128>}]} {
    %c0 = arith.constant 0 : index
    %c0_0 = arith.constant 0 : index
    %c0_1 = arith.constant 0 : index
    %0 = vector.load %arg1[%c0, %c0_0, %c0_1] : memref<2x1x32xf32, #tpu.memory_space<vmem>>, vector<2x1x32xf32>
    %c0_2 = arith.constant 0 : index
    %c0_3 = arith.constant 0 : index
    %c0_4 = arith.constant 0 : index
    %1 = vector.load %arg2[%c0_2, %c0_3, %c0_4] : memref<2x128x32xf32, #tpu.memory_space<vmem>>, vector<2x128x32xf32>
    "tpu.trace_start"() <{level = 10 : i32, message = "bqh,bth->bqt"}> : () -> ()
    %cst = arith.constant dense<0.000000e+00> : vector<2x1x128xf32>
    %2 = tpu.matmul %0, %1, %cst {dimension_numbers = #tpu.dot_dimension_numbers<[2], [2], [1], [1], [0, 0, 0, 1, 1, 1], [0], [0]>} : vector<2x1x32xf32>, vector<2x128x32xf32>, vector<2x1x128xf32> -> vector<2x1x128xf32>
    "tpu.trace_stop"() : () -> ()
    %c0_5 = arith.constant 0 : index
    %c0_6 = arith.constant 0 : index
    %c0_7 = arith.constant 0 : index
    %3 = vector.load %arg3[%c0_5, %c0_6, %c0_7] : memref<2x1x128xf32, #tpu.memory_space<vmem>>, vector<2x1x128xf32>
    tpu.vector_store %arg3[%c0_5, %c0_6, %c0_7], %2 {strides = array<i32>} : memref<2x1x128xf32, #tpu.memory_space<vmem>>, vector<2x1x128xf32>,
    return
  }
  func.func @transform_0(%arg0: i32) -> (i32, i32, i32) {
    %c0_i32 = arith.constant 0 : i32
    %c0_i32_0 = arith.constant 0 : i32
    %c0_i32_1 = arith.constant 0 : i32
    %c0_i32_2 = arith.constant 0 : i32
    return %c0_i32, %c0_i32_0, %c0_i32_1 : i32, i32, i32
  }
  func.func @transform_1(%arg0: i32) -> (i32, i32, i32) {
    %c0_i32 = arith.constant 0 : i32
    %c0_i32_0 = arith.constant 0 : i32
    %c0_i32_1 = arith.constant 0 : i32
    return %c0_i32, %arg0, %c0_i32_0 : i32, i32, i32
  }
  func.func @transform_2(%arg0: i32) -> (i32, i32, i32) {
    %c0_i32 = arith.constant 0 : i32
    %c0_i32_0 = arith.constant 0 : i32
    %c0_i32_1 = arith.constant 0 : i32
    return %c0_i32, %c0_i32_0, %arg0 : i32, i32, i32
  }
}

</mosaic_0001>

<bundles_post_ra>
// kernel: tpu_custom_call.1
= control target key start
LH: loop header
LB: loop body
LE: loop exit
PB: predicated region body
PF: predicated region fallthrough
CT: control target
= control target key end

     0   :  { %vm46_vm0 = vcmask 261120   ;;  %v539_v3 = vmov 0.0|0.0   ;;  %vm540_vm2 = vmmov 0   ;;  %v541_v8 = vmov 0.0   ;;  %s730_s0 = inlined_call_operand.vmem [shape: f32[2,1,32], index: 0, kind: input, shape index: {}]   ;;  %s731_s1 = inlined_call_operand.vmem [shape: f32[2,128,32], index: 1, kind: input, shape index: {}]   ;;  %s732_s2 = inlined_call_operand.hbm [shape: f32[2,1,128], index: 2, kind: output, shape index: {}]  }
   0x1   :  { %v14_v0 = vld [vmem:[%s731_s1] sm:$0xff]  ;;  %v15_v1 = vld [vmem:[%s731_s1 + $0x8] sm:$0xff]  ;;  %445 = vmatprep.subr.bf16.mxu0 %v539_v3  ;;  %477 = vmatprep.subr.bf16.mxu1 %v539_v3  ;;  %vm573_vm1 = vmpackc.low %vm46_vm0, %vm46_vm0 }
   0x2   :  { %v30_v2 = vld [vmem:[%s731_s1 + $0x80] sm:$0xff]  ;;  %v446_v4 = vpack.c.bf16 %v15_v1, %v14_v0  ;;  %v31_v6 = vld [vmem:[%s731_s1 + $0x88] sm:$0xff]  ;;  %407 = vmatprep.mubr.msk.f32.mxu0 %vm540_vm2, %v541_v8  ;;  %442 = vmatprep.mubr.msk.f32.mxu1 %vm540_vm2, %v541_v8  ;;  %v16_v9 = vld [vmem:[%s731_s1 + $0x10] sm:$0xff] }
   0x3   :  { %v478_v7 = vpack.c.bf16 %v31_v6, %v30_v2  ;;  %v17_v10 = vld [vmem:[%s731_s1 + $0x18] sm:$0xff]  ;;  %v32_v11 = vld [vmem:[%s731_s1 + $0x90] sm:$0xff] }
   0x4   :  { %448 = vmatpush3.bf16.xpose.msk.msra.mxu0 %vm573_vm1, %v446_v4  ;;  %v33_v12 = vld [vmem:[%s731_s1 + $0x98] sm:$0xff]  ;;  %v450_v13 = vpack.c.bf16 %v17_v10, %v16_v9 }
   0x5   :  { %480 = vmatpush3.bf16.xpose.msk.msra.mxu1 %vm573_vm1, %v478_v7  ;;  %449 = vmatprep.subr.bf16.mxu0 %v539_v3  ;;  %v482_v14 = vpack.c.bf16 %v33_v12, %v32_v11 }
   0x6   :  { %481 = vmatprep.subr.bf16.mxu1 %v539_v3 }
   0xc   :  { %452 = vmatpush3.bf16.xpose.msk.msra.mxu0 %vm573_vm1, %v450_v13 }
   0xd   :  { %7 = vsyncpa [#allocation3], 0  ;;  %484 = vmatpush3.bf16.xpose.msk.msra.mxu1 %vm573_vm1, %v482_v14  ;;  %453 = vmatprep.subr.bf16.mxu0 %v539_v3  ;;  %v18_v15 = vld [vmem:[%s731_s1 + $0x20] sm:$0xff]  ;;  %v19_v16 = vld [vmem:[%s731_s1 + $0x28] sm:$0xff] }
   0xe   :  { %485 = vmatprep.subr.bf16.mxu1 %v539_v3  ;;  %v34_v17 = vld [vmem:[%s731_s1 + $0xa0] sm:$0xff]  ;;  %v35_v18 = vld [vmem:[%s731_s1 + $0xa8] sm:$0xff]  ;;  %v454_v19 = vpack.c.bf16 %v19_v16, %v18_v15  ;;  %v20_v21 = vld [vmem:[%s731_s1 + $0x30] sm:$0xff] }
   0xf   :  { %v486_v20 = vpack.c.bf16 %v35_v18, %v34_v17  ;;  %v21_v22 = vld [vmem:[%s731_s1 + $0x38] sm:$0xff]  ;;  %v36_v23 = vld [vmem:[%s731_s1 + $0xb0] sm:$0xff]  ;;  %v22_v27 = vld [vmem:[%s731_s1 + $0x40] sm:$0xff] }
  0x10   :  { %v37_v24 = vld [vmem:[%s731_s1 + $0xb8] sm:$0xff]  ;;  %v458_v25 = vpack.c.bf16 %v21_v22, %v20_v21  ;;  %v23_v28 = vld [vmem:[%s731_s1 + $0x48] sm:$0xff]  ;;  %v38_v29 = vld [vmem:[%s731_s1 + $0xc0] sm:$0xff] }
  0x11   :  { %v490_v26 = vpack.c.bf16 %v37_v24, %v36_v23  ;;  %v39_v30 = vld [vmem:[%s731_s1 + $0xc8] sm:$0xff]  ;;  %v462_v31 = vpack.c.bf16 %v23_v28, %v22_v27  ;;  %v24_v33 = vld [vmem:[%s731_s1 + $0x50] sm:$0xff]  ;;  %v25_v34 = vld [vmem:[%s731_s1 + $0x58] sm:$0xff] }
  0x12   :  { %v494_v32 = vpack.c.bf16 %v39_v30, %v38_v29  ;;  %v40_v35 = vld [vmem:[%s731_s1 + $0xd0] sm:$0xff]  ;;  %v41_v36 = vld [vmem:[%s731_s1 + $0xd8] sm:$0xff]  ;;  %v466_v37 = vpack.c.bf16 %v25_v34, %v24_v33  ;;  %v26_v39 = vld [vmem:[%s731_s1 + $0x60] sm:$0xff] }
  0x13   :  { %v498_v38 = vpack.c.bf16 %v41_v36, %v40_v35  ;;  %v27_v40 = vld [vmem:[%s731_s1 + $0x68] sm:$0xff]  ;;  %v42_v41 = vld [vmem:[%s731_s1 + $0xe0] sm:$0xff]  ;;  %v28_v45 = vld [vmem:[%s731_s1 + $0x70] sm:$0xff] }
  0x14   :  { %456 = vmatpush3.bf16.xpose.msk.msra.mxu0 %vm573_vm1, %v454_v19  ;;  %v43_v42 = vld [vmem:[%s731_s1 + $0xe8] sm:$0xff]  ;;  %v470_v43 = vpack.c.bf16 %v27_v40, %v26_v39  ;;  %v29_v46 = vld [vmem:[%s731_s1 + $0x78] sm:$0xff]  ;;  %v44_v47 = vld [vmem:[%s731_s1 + $0xf0] sm:$0xff] }
  0x15   :  { %488 = vmatpush3.bf16.xpose.msk.msra.mxu1 %vm573_vm1, %v486_v20  ;;  %457 = vmatprep.subr.bf16.mxu0 %v539_v3  ;;  %v502_v44 = vpack.c.bf16 %v43_v42, %v42_v41  ;;  %v45_v48 = vld [vmem:[%s731_s1 + $0xf8] sm:$0xff]  ;;  %v474_v49 = vpack.c.bf16 %v29_v46, %v28_v45  ;;  %v12_v51 = vld [vmem:[%s730_s0] sm:$0x1]  ;;  %v13_v52 = vld [vmem:[%s730_s0 + $0x1] sm:$0x1]  ;;  %s542_s1 = smov [#allocation2]  }
  0x16   :  { %489 = vmatprep.subr.bf16.mxu1 %v539_v3  ;;  %v506_v50 = vpack.c.bf16 %v45_v48, %v44_v47  ;;  %s296_s21 = sshll.u32 %s542_s1, 4  ;;  %s297_s21 = int_to_ptr.vmem [resolvable:$true] %s296_s21 }
  0x17   :  { %s515_s22 = scalar_lea.vmem %s297_s21, 32  ;;  %p520_p1 = scmp.lt.s32.totalorder %s297_s21, %s297_s21 }
  0x18   :  { %p516_p0 = scmp.ne.s32.totalorder %s297_s21, %s515_s22  ;;  %p521_p2 = scmp.lt.s32.totalorder %s515_s22, %s515_s22 }
  0x1a   :  { %p522_p3 = por %p521_p2, %p520_p1 }
  0x1c   :  { %460 = vmatpush3.bf16.xpose.msk.msra.mxu0 %vm573_vm1, %v458_v25  ;;  %p523_p4 = pnand %p522_p3, %p516_p0 }
  0x1d   :  { %492 = vmatpush3.bf16.xpose.msk.msra.mxu1 %vm573_vm1, %v490_v26  ;;  %461 = vmatprep.subr.bf16.mxu0 %v539_v3 }
  0x1e   :  { %493 = vmatprep.subr.bf16.mxu1 %v539_v3 }
  0x24   :  { %464 = vmatpush3.bf16.xpose.msk.msra.mxu0 %vm573_vm1, %v462_v31 }
  0x25   :  { %496 = vmatpush3.bf16.xpose.msk.msra.mxu1 %vm573_vm1, %v494_v32  ;;  %465 = vmatprep.subr.bf16.mxu0 %v539_v3 }
  0x26   :  { %497 = vmatprep.subr.bf16.mxu1 %v539_v3 }
  0x2c   :  { %468 = vmatpush3.bf16.xpose.msk.msra.mxu0 %vm573_vm1, %v466_v37 }
  0x2d   :  { %500 = vmatpush3.bf16.xpose.msk.msra.mxu1 %vm573_vm1, %v498_v38  ;;  %469 = vmatprep.subr.bf16.mxu0 %v539_v3 }
  0x2e   :  { %501 = vmatprep.subr.bf16.mxu1 %v539_v3 }
  0x34   :  { %472 = vmatpush3.bf16.xpose.msk.msra.mxu0 %vm573_vm1, %v470_v43 }
  0x35   :  { %504 = vmatpush3.bf16.xpose.msk.msra.mxu1 %vm573_vm1, %v502_v44  ;;  %473 = vmatprep.subr.bf16.mxu0 %v539_v3 }
  0x36   :  { %505 = vmatprep.subr.bf16.mxu1 %v539_v3 }
  0x3c   :  { %476 = vmatpush3.bf16.xpose.msk.msra.mxu0 %vm573_vm1, %v474_v49 }
  0x3d   :  { %508 = vmatpush3.bf16.xpose.msk.msra.mxu1 %vm573_vm1, %v506_v50 }
  0x43   :  { %408 = vmatmul.mubr.msk.f32.vlgmr.msra.gmra.mrb[0].mxu0 %vm46_vm0, %v12_v51 }
  0x44   :  { %443 = vmatmul.mubr.msk.f32.vlgmr.msra.gmra.mrb[0].mxu1 %vm46_vm0, %v13_v52 }
 0x116   :  { %v164_v53 = vpop.f32.mrb[0].mxu0 }
 0x117   :  { %289 = vst [vmem:[#allocation2] sm:$0x1] %v164_v53  ;;  %v285_v54 = vpop.f32.mrb[0].mxu1  ;;  %v409_v55 = vpop.f32.mrb[1].mxu0 }
 0x118   :  { %290 = vst [vmem:[#allocation2 + $0x1] sm:$0x1] %v285_v54  ;;  %v444_v56 = vpop.f32.mrb[1].mxu1 }
 0x119   :  { %526 = shalt.err (!%p523_p4)
}
 0x11a   :  { %s527_s24 = scalar_lea.hbm %s732_s2, 32 }
 0x11b   :  { %p528_p5 = scmp.ne.s32.totalorder %s732_s2, %s527_s24  ;;  %p531_p6 = scmp.lt.u32.totalorder %s527_s24, %s732_s2 }
 0x11d   :  { %p533_p7 = pnand %p531_p6, %p528_p5 }
 0x11f   :  { %536 = shalt.err (!%p533_p7)
}
 0x120   :  { %s543_s29 = smov 16   ;;  %s544_s30 = smov 1  }
 0x121   :  { %302 = dma.vmem_to_hbm [thread:$0]  %s297_s21, 32, %s732_s2, [#allocation3], %s543_s29, %s543_s29, %s544_s30  }
 0x122   :  { %537 = dma.done.wait [#allocation3], 32  }
 0x123   :  { %538 = vsyncadd [#allocation3], 4294967264 }
 0x124   :  { %306 = vsyncpa [#allocation3], 1 }

</bundles_post_ra>
